<compile_context>
chip_gen: v7x
topology: tpu7x:2x2x1
jax: 0.10.0
libtpu: 0.0.40
codegen_flags: <defaults>
</compile_context>

<pallas_src>
import jax
import jax.numpy as jnp
from jax import lax
from jax.experimental import pallas as pl
from jax.experimental.pallas import tpu as pltpu


def _matching_attention_general_kernel(m_ref, x_ref, wt_ref, pool_ref, alpha_ref):
    # m_ref:     (1, S, D)   memory M for this batch element (batch-major layout)
    # x_ref:     (1, 1, Dc)  candidate vector for this batch element
    # wt_ref:    (Dc, D)     transform weight, already transposed (W.T)
    # pool_ref:  (1, 1, D)   attention-pooled memory (output)
    # alpha_ref: (1, 1, S)   attention weights (output)
    m = m_ref[0].astype(jnp.float32)          # (S, D)
    xv = x_ref[0].astype(jnp.float32)         # (1, Dc)
    wt = wt_ref[...].astype(jnp.float32)      # (Dc, D)

    # x_ = transform(x)  -> (1, D)
    xt = jnp.dot(xv, wt, preferred_element_type=jnp.float32)

    # scores = x_ . M_b over mem_dim -> (1, S); contraction on the last dim of
    # both operands avoids an explicit transpose of m.
    scores = lax.dot_general(
        xt, m,
        dimension_numbers=(((1,), (1,)), ((), ())),
        preferred_element_type=jnp.float32)

    # Numerically-stable softmax over the sequence axis.
    scores = scores - jnp.max(scores, axis=1, keepdims=True)
    e = jnp.exp(scores)
    alpha = e / jnp.sum(e, axis=1, keepdims=True)             # (1, S)

    # attn_pool = alpha @ M_b -> (1, D)
    pool = jnp.dot(alpha, m, preferred_element_type=jnp.float32)

    pool_ref[0] = pool.astype(pool_ref.dtype)
    alpha_ref[0] = alpha.astype(alpha_ref.dtype)


def matching_attention_general(M, x, W):
    """M: (seq_len, batch, mem_dim); x: (batch, cand_dim);
       W: (mem_dim, cand_dim)  == nn.Linear(cand_dim, mem_dim, bias=False).weight.
       Returns (attn_pool (batch, mem_dim), alpha (batch, 1, seq_len))."""
    S, B, D = M.shape
    Dc = x.shape[1]
    out_dtype = M.dtype

    # Batch-major memory so each grid step streams one (S, D) tile; compute is
    # done in f32 inside the kernel regardless of input dtype (bf16 inputs OK,
    # halving HBM traffic — no forced f32 copy in the wrapper).
    M_b = jnp.transpose(M, (1, 0, 2))      # (B, S, D)
    x3 = x.reshape(B, 1, Dc)               # (B, 1, Dc)
    Wt = W.T                               # (Dc, D)

    pool, alpha = pl.pallas_call(
        _matching_attention_general_kernel,
        grid=(B,),
        out_shape=(jax.ShapeDtypeStruct((B, 1, D), out_dtype),
                   jax.ShapeDtypeStruct((B, 1, S), out_dtype)),
        in_specs=[
            pl.BlockSpec((1, S, D), lambda b: (b, 0, 0)),
            pl.BlockSpec((1, 1, Dc), lambda b: (b, 0, 0)),
            pl.BlockSpec((Dc, D), lambda b: (0, 0)),   # weight stays resident
        ],
        out_specs=(
            pl.BlockSpec((1, 1, D), lambda b: (b, 0, 0)),
            pl.BlockSpec((1, 1, S), lambda b: (b, 0, 0)),
        ),
        compiler_params=pltpu.CompilerParams(
            dimension_semantics=("parallel",)),
    )(M_b, x3, Wt)

    return pool.reshape(B, D), alpha


def _reference(M, x, W):
    # Pure-JAX transcription of the PyTorch forward (att_type='general').
    xt = x @ W.T                                    # (B, D)
    M_b = jnp.transpose(M, (1, 0, 2))               # (B, S, D)
    scores = jnp.einsum('bd,bsd->bs', xt, M_b)      # (B, S)
    alpha = jax.nn.softmax(scores, axis=1)          # (B, S)
    pool = jnp.einsum('bs,bsd->bd', alpha, M_b)     # (B, D)
    return pool, alpha[:, None, :]


if __name__ == "__main__":
    key = jax.random.PRNGKey(0)
    seq_len, batch, mem_dim, cand_dim = 8, 2, 32, 32

    k1, k2, k3 = jax.random.split(key, 3)
    M = jax.random.normal(k1, (seq_len, batch, mem_dim), dtype=jnp.float32)
    x = jax.random.normal(k2, (batch, cand_dim), dtype=jnp.float32)
    W = jax.random.normal(k3, (mem_dim, cand_dim), dtype=jnp.float32) * 0.1

    attn_pool, alpha = matching_attention_general(M, x, W)
    attn_pool = jax.block_until_ready(attn_pool)
    alpha = jax.block_until_ready(alpha)

    ref_pool, ref_alpha = _reference(M, x, W)
    assert attn_pool.shape == (batch, mem_dim)
    assert alpha.shape == (batch, 1, seq_len)
    assert jnp.allclose(attn_pool, ref_pool, atol=1e-5, rtol=1e-5), (attn_pool, ref_pool)
    assert jnp.allclose(alpha, ref_alpha, atol=1e-5, rtol=1e-5), (alpha, ref_alpha)
    print("KERNEL_OK")
</pallas_src>

<mosaic_0001>
module attributes {stable_mosaic.version = 11 : i64} {
  func.func @_matching_attention_general_kernel(%arg0: i32, %arg1: memref<1x8x32xf32, #tpu.memory_space<vmem>>, %arg2: memref<1x1x32xf32, #tpu.memory_space<vmem>>, %arg3: memref<32x32xf32, #tpu.memory_space<vmem>>, %arg4: memref<1x1x32xf32, #tpu.memory_space<vmem>>, %arg5: memref<1x1x8xf32, #tpu.memory_space<vmem>>) attributes {dimension_semantics = [#tpu.dimension_semantics<parallel>], iteration_bounds = array<i64: 2>, scalar_prefetch = 0 : i64, scratch_operands = 0 : i64, tpu.core_type = #tpu.core_type<tc>, window_params = [{transform_indices = @transform_0, window_bounds = array<i64: 1, 8, 32>}, {transform_indices = @transform_1, window_bounds = array<i64: 1, 1, 32>}, {pipeline_mode = #tpu.pipeline_mode<synchronous>, transform_indices = @transform_2, window_bounds = array<i64: 32, 32>}, {transform_indices = @transform_3, window_bounds = array<i64: 1, 1, 32>}, {transform_indices = @transform_4, window_bounds = array<i64: 1, 1, 8>}]} {
    %c0 = arith.constant 0 : index
    %c0_0 = arith.constant 0 : index
    %c0_1 = arith.constant 0 : index
    %0 = vector.load %arg1[%c0, %c0_0, %c0_1] : memref<1x8x32xf32, #tpu.memory_space<vmem>>, vector<1x8x32xf32>
    %1 = vector.shape_cast %0 : vector<1x8x32xf32> to vector<8x32xf32>
    %c0_2 = arith.constant 0 : index
    %c0_3 = arith.constant 0 : index
    %c0_4 = arith.constant 0 : index
    %2 = vector.load %arg2[%c0_2, %c0_3, %c0_4] : memref<1x1x32xf32, #tpu.memory_space<vmem>>, vector<1x1x32xf32>
    %3 = vector.shape_cast %2 : vector<1x1x32xf32> to vector<1x32xf32>
    %c0_5 = arith.constant 0 : index
    %c0_6 = arith.constant 0 : index
    %4 = vector.load %arg3[%c0_5, %c0_6] : memref<32x32xf32, #tpu.memory_space<vmem>>, vector<32x32xf32>
    %cst = arith.constant dense<0.000000e+00> : vector<1x32xf32>
    %5 = tpu.matmul %3, %4, %cst {dimension_numbers = #tpu.dot_dimension_numbers<[1], [0], [0], [1], [0, 0, 1, 1], [], []>} : vector<1x32xf32>, vector<32x32xf32>, vector<1x32xf32> -> vector<1x32xf32>
    %cst_7 = arith.constant dense<0.000000e+00> : vector<1x8xf32>
    %6 = tpu.matmul %5, %1, %cst_7 {dimension_numbers = #tpu.dot_dimension_numbers<[1], [1], [0], [0], [0, 0, 1, 0], [], []>} : vector<1x32xf32>, vector<8x32xf32>, vector<1x8xf32> -> vector<1x8xf32>
    %cst_8 = arith.constant dense<0xFF800000> : vector<1xf32>
    %7 = vector.multi_reduction <maximumf>, %6, %cst_8 [1] : vector<1x8xf32> to vector<1xf32>
    %8 = vector.shape_cast %7 : vector<1xf32> to vector<1x1xf32>
    %9 = vector.broadcast %8 : vector<1x1xf32> to vector<1x8xf32>
    %10 = arith.subf %6, %9 : vector<1x8xf32>
    %11 = math.exp %10 : vector<1x8xf32>
    %cst_9 = arith.constant dense<0.000000e+00> : vector<1xf32>
    %12 = vector.multi_reduction <add>, %11, %cst_9 [1] : vector<1x8xf32> to vector<1xf32>
    %13 = vector.shape_cast %12 : vector<1xf32> to vector<1x1xf32>
    %14 = vector.broadcast %13 : vector<1x1xf32> to vector<1x8xf32>
    %15 = arith.divf %11, %14 : vector<1x8xf32>
    %cst_10 = arith.constant dense<0.000000e+00> : vector<1x32xf32>
    %16 = tpu.matmul %15, %1, %cst_10 {dimension_numbers = #tpu.dot_dimension_numbers<[1], [0], [0], [1], [0, 0, 1, 1], [], []>} : vector<1x8xf32>, vector<8x32xf32>, vector<1x32xf32> -> vector<1x32xf32>
    %c0_11 = arith.constant 0 : index
    %c0_12 = arith.constant 0 : index
    %c0_13 = arith.constant 0 : index
    %17 = vector.load %arg4[%c0_11, %c0_12, %c0_13] : memref<1x1x32xf32, #tpu.memory_space<vmem>>, vector<1x1x32xf32>
    %18 = vector.shape_cast %17 : vector<1x1x32xf32> to vector<1x32xf32>
    %19 = vector.shape_cast %16 : vector<1x32xf32> to vector<1x1x32xf32>
    tpu.vector_store %arg4[%c0_11, %c0_12, %c0_13], %19 {strides = array<i32>} : memref<1x1x32xf32, #tpu.memory_space<vmem>>, vector<1x1x32xf32>,
    %c0_14 = arith.constant 0 : index
    %c0_15 = arith.constant 0 : index
    %c0_16 = arith.constant 0 : index
    %20 = vector.load %arg5[%c0_14, %c0_15, %c0_16] : memref<1x1x8xf32, #tpu.memory_space<vmem>>, vector<1x1x8xf32>
    %21 = vector.shape_cast %20 : vector<1x1x8xf32> to vector<1x8xf32>
    %22 = vector.shape_cast %15 : vector<1x8xf32> to vector<1x1x8xf32>
    tpu.vector_store %arg5[%c0_14, %c0_15, %c0_16], %22 {strides = array<i32>} : memref<1x1x8xf32, #tpu.memory_space<vmem>>, vector<1x1x8xf32>,
    return
  }
  func.func @transform_0(%arg0: i32) -> (i32, i32, i32) {
    %c0_i32 = arith.constant 0 : i32
    %c0_i32_0 = arith.constant 0 : i32
    %c0_i32_1 = arith.constant 0 : i32
    return %arg0, %c0_i32, %c0_i32_0 : i32, i32, i32
  }
  func.func @transform_1(%arg0: i32) -> (i32, i32, i32) {
    %c0_i32 = arith.constant 0 : i32
    %c0_i32_0 = arith.constant 0 : i32
    %c0_i32_1 = arith.constant 0 : i32
    return %arg0, %c0_i32, %c0_i32_0 : i32, i32, i32
  }
  func.func @transform_2(%arg0: i32) -> (i32, i32) {
    %c0_i32 = arith.constant 0 : i32
    %c0_i32_0 = arith.constant 0 : i32
    %c0_i32_1 = arith.constant 0 : i32
    return %c0_i32, %c0_i32_0 : i32, i32
  }
  func.func @transform_3(%arg0: i32) -> (i32, i32, i32) {
    %c0_i32 = arith.constant 0 : i32
    %c0_i32_0 = arith.constant 0 : i32
    %c0_i32_1 = arith.constant 0 : i32
    return %arg0, %c0_i32, %c0_i32_0 : i32, i32, i32
  }
  func.func @transform_4(%arg0: i32) -> (i32, i32, i32) {
    %c0_i32 = arith.constant 0 : i32
    %c0_i32_0 = arith.constant 0 : i32
    %c0_i32_1 = arith.constant 0 : i32
    return %arg0, %c0_i32, %c0_i32_0 : i32, i32, i32
  }
}

</mosaic_0001>

<bundles_post_ra>
// kernel: tpu_custom_call.1
= control target key start
LH: loop header
LB: loop body
LE: loop exit
PB: predicated region body
PF: predicated region fallthrough
CT: control target
= control target key end

     0   :  { %10 = vsyncpa [#allocation3], 0  ;;  %s1195_s0 = inlined_call_operand.hbm [shape: f32[2,8,32], index: 0, kind: input, shape index: {}]   ;;  %s1196_s1 = inlined_call_operand.vmem [shape: f32[2,1,32], index: 1, kind: input, shape index: {}]   ;;  %s1197_s2 = inlined_call_operand.hbm [shape: f32[32,32], index: 2, kind: input, shape index: {}]   ;;  %s1198_s3 = inlined_call_operand.hbm [shape: f32[2,1,32], index: 3, kind: output, shape index: {0}]   ;;  %s1199_s4 = inlined_call_operand.hbm [shape: f32[2,1,8], index: 4, kind: output, shape index: {1}]  }
   0x1   :  { %12 = vsyncpa [#allocation3 + $0x1], 0 }
   0x2   :  { %13 = vsyncpa [#allocation6], 0 }
   0x3   :  { %14 = vsyncpa [#allocation4], 0 }
   0x4   :  { %16 = vsyncpa [#allocation4 + $0x1], 0 }
   0x5   :  { %17 = vsyncpa [#allocation9], 0 }
   0x6   :  { %19 = vsyncpa [#allocation9 + $0x1], 0  ;;  %s959_s15 = smov 0   ;;  %s961_s16 = smov 0  }
   0x7   :  { %s963_s17 = smov 0   ;;  %s965_s18 = smov 0  }
   0x8 LB: > { %s980_s19 = sadd.s32 4294967295, %s923_s18   ;;  %s639_s20 = sadd.s32 4294967294, %s923_s18   ;;  %s923_s18 = sphi %s965_s18, %s1219_s18   ;;  %s919_s17 = sphi %s963_s17, %s1218_s17   ;;  %s915_s16 = sphi %s961_s16, %s1217_s16   ;;  %s911_s15 = sphi %s959_s15, %s1216_s15  }
   0x9   : > { %p45_p0 = scmp.ne.s32.totalorder %s915_s16, %s911_s15  ;;  %p1200_p1 = scmp.eq.s32.totalorder %s980_s19, 0 }
   0xa   : > { %p122_p3 = scmp.eq.s32.totalorder %s639_s20, 1  ;;  %p640_p5 = scmp.ge.s32.totalorder %s923_s18, 1 }
   0xb   : > { %p989_p4 = por %p1200_p1, %p45_p0  ;;  %p155_p7 = scmp.lt.s32.totalorder %s923_s18, 3 }
   0xc   : > { %p994_p6 = por %p122_p3, %p45_p0  ;;  %s925_s24 = smov [#allocation5]  }
   0xd   : > { %s1203_s21 = scalar_select %p989_p4, 1, 0 }
   0xe   : > { %s1204_s22 = scalar_select %p994_p6, 1, 0 }
   0xf   : > { %p999_p8 = pnand %p640_p5, %p155_p7  ;;  %s167_s25 = sshll.u32 %s925_s24, 4  ;;  %s1003_s25 = int_to_ptr.vmem [resolvable:$true] %s167_s25 }
  0x10   : > { %s1015_s27 = sadd.s32 1, %s923_s18   ;;  %s32_s28 = sadd.s32 1, %s919_s17 }
  0x11   : > { %s1205_s23 = scalar_select %p999_p8, 1, 0 }
  0x12   : > { %p702_p9 = pneg %p999_p8  ;;  %s29_s29 = ssub.s32 %s923_s18, %s1015_s27 }
  0x13   : > { %s763_s6 = scalar_lea.hbm %s1197_s2, 512 }
  0x14   : > { %p1010_p11 = pnand %p702_p9, %p1200_p1  ;;  %p764_p12 = scmp.ne.s32.totalorder %s1197_s2, %s763_s6 }
  0x15   : > { %p770_p5 = scmp.lt.u32.totalorder %s763_s6, %s1197_s2 }
  0x16   : > { %p765_p13 = pneg %p1010_p11 }
  0x18   : > { %p766_p0 = pnand %p765_p13, %p764_p12 }
  0x1a   : > { %p767_p3 = pneg %p766_p0 }
  0x1c   : > { %p772_p7 = pnand %p770_p5, %p767_p3 }
  0x1e   : > { %775 = shalt.err (!%p772_p7)
}
  0x1f   : > { %s776_s11 = scalar_lea.vmem %s1003_s25, 512  ;;  %p784_p2 = scmp.lt.s32.totalorder %s1003_s25, %s1003_s25 }
  0x20   : > { %p777_p9 = scmp.ne.s32.totalorder %s1003_s25, %s776_s11  ;;  %p785_p6 = scmp.lt.s32.totalorder %s776_s11, %s776_s11 }
  0x22   : > { %p779_p10 = pnand %p777_p9, %p765_p13  ;;  %p786_p4 = por %p785_p6, %p784_p2 }
  0x24   : > { %p780_p1 = pneg %p779_p10 }
  0x26   : > { %p787_p8 = pnand %p786_p4, %p780_p1 }
  0x28   : > { %790 = shalt.err (!%p787_p8)
}
  0x29   : > { %s926_s12 = smov 128   ;;  %s927_s13 = smov 8  }
  0x2a   : > { %705 = dma.hbm_to_vmem [thread:$0]  (!%p1010_p11), %s1197_s2, 512, %s1003_s25, [#allocation6], %s926_s12, %s926_s12, %s927_s13  }
  0x2b   : > { %p30_p2 = scmp.eq.s32.totalorder %s29_s29, 0  ;;  %p39_p1 = scmp.ne.s32.totalorder %s919_s17, %s915_s16 }
  0x2c   : > { %p40_p4 = scmp.eq.s32.totalorder %s923_s18, 0  ;;  %p718_p6 = scmp.lt.s32.totalorder %s923_s18, 2 }
  0x2d   : > { %s1046_s24 = scalar_select %p30_p2, %s919_s17, %s32_s28  }
  0x2e   : > { %p41_p8 = por %p40_p4, %p39_p1  ;;  %p1207_p10 = scmp.eq.s32.totalorder %s980_s19, 1 }
  0x2f   : > { %s181_s5 = sand.u32 1, %s919_s17   ;;  %s644_s6 = sshll.u32 %s923_s18, 7 }
  0x30   : > { %p1050_p12 = por %p1207_p10, %p39_p1  ;;  %s643_s7 = sshll.u32 %s181_s5, 3 }
  0x31   : > { %s1059_s9 = scalar_lea.hbm %s1195_s0, %s644_s6  ;;  %s185_s25 = scalar_lea.vmem [#allocation2], %s643_s7 }
  0x32   : > { %s192_s28 = sshll.u32 %s185_s25, 4  ;;  %p1061_p11 = pnand %p718_p6, %p41_p8  ;;  %s1065_s28 = int_to_ptr.vmem [resolvable:$true] %s192_s28 }
  0x33   : > { %s182_s10 = scalar_lea.sflag [#allocation3], %s181_s5  ;;  %s791_s11 = scalar_lea.hbm %s1059_s9, 128 }
  0x34   : > { %p792_p13 = scmp.ne.s32.totalorder %s1059_s9, %s791_s11  ;;  %p793_p0 = pneg %p1061_p11 }
  0x35   : > { %s796_s14 = scalar_lea.hbm %s1195_s0, 256  ;;  %p797_p7 = scmp.lt.u32.totalorder %s1059_s9, %s1195_s0 }
  0x36   : > { %p794_p3 = pnand %p793_p0, %p792_p13  ;;  %p798_p9 = scmp.lt.u32.totalorder %s796_s14, %s791_s11 }
  0x37   : > { %p800_p1 = scmp.lt.u32.totalorder %s791_s11, %s1059_s9 }
  0x38   : > { %p795_p5 = pneg %p794_p3  ;;  %p799_p2 = por %p798_p9, %p797_p7 }
  0x3a   : > { %p801_p4 = por %p800_p1, %p799_p2 }
  0x3c   : > { %p802_p6 = pnand %p801_p4, %p795_p5 }
  0x3e   : > { %805 = shalt.err (!%p802_p6)
}
  0x3f   : > { %s806_s5 = scalar_lea.vmem %s1065_s28, 128  ;;  %s928_s7 = smov [#allocation2]  }
  0x40   : > { %p807_p8 = scmp.ne.s32.totalorder %s1065_s28, %s806_s5  ;;  %s811_s26 = sshll.u32 %s928_s7, 4  ;;  %s812_s26 = int_to_ptr.vmem [resolvable:$false] %s811_s26 }
  0x41   : > { %s813_s8 = scalar_lea.vmem %s812_s26, 256  ;;  %p814_p3 = scmp.lt.s32.totalorder %s1065_s28, %s812_s26 }
  0x42   : > { %p809_p10 = pnand %p807_p8, %p793_p0  ;;  %p815_p7 = scmp.lt.s32.totalorder %s813_s8, %s806_s5 }
  0x44   : > { %p810_p13 = pneg %p809_p10  ;;  %p816_p9 = por %p815_p7, %p814_p3 }
  0x46   : > { %p817_p2 = pnand %p816_p9, %p810_p13 }
  0x48   : > { %820 = shalt.err (!%p817_p2)
}
  0x49   : > { %709 = dma.hbm_to_vmem [thread:$0]  (!%p1061_p11), %s1059_s9, 128, %s1065_s28, %s182_s10  }
  0x4a   : > { %p1210_p5 = scmp.ne.s32.totalorder %s1205_s23, 0 }
  0x4b   : > { %s1095_s25 = sand.u32 (!%p1210_p5), 1, %s915_s16   ;;  %p1211_p0 = scmp.ne.s32.totalorder (!%p1210_p5), %s1203_s21, 0 }
  0x4c   : > { %207 = sbr.rel (%p1210_p5) target bundleno = 1061 (0x425), region = 32  ;;  %s646_s11 = sshll.u32 (!%p1210_p5), %s1095_s25, 3 }
  0x4d   : > { %s210_s12 = scalar_lea.sflag (!%p1210_p5), [#allocation3], %s1095_s25  ;;  %s213_s13 = scalar_lea.vmem (!%p1210_p5), [#allocation2], %s646_s11 }
  0x53   : > { %894 = dma.done.wait (%p1211_p0), %s210_s12, 128  }
  0x54   : > { %896 = vsyncadd (%p1211_p0), %s210_s12, 4294967168  ;;  %p1212_p1 = scmp.eq.s32.totalorder %s980_s19, 0 }
  0x56   : > { %898 = dma.done.wait (%p1212_p1), [#allocation6], 512   ;;  %p1213_p11 = pmov %p1212_p1 }
  0x57   : > { %v929_v0 = vmov 0.0|0.0   ;;  %vm930_vm0 = vmmov 0   ;;  %v931_v1 = vmov 0.0   ;;  %p248_p4 = scmp.lt.s32.totalorder %s980_s19, 1  ;;  %v253_v2 = vld [vmem:[#allocation5] sm:$0xff]  ;;  %v254_v3 = vld [vmem:[#allocation5 + $0x8] sm:$0xff] }
  0x58   : > { %900 = vsyncadd (%p1213_p11), [#allocation6], 4294966784  ;;  %686 = vmatprep.subr.bf16.mxu0 %v929_v0  ;;  %673 = vmatprep.mubr.msk.f32.mxu0 %vm930_vm0, %v931_v1  ;;  %v255_v4 = vld [vmem:[#allocation5 + $0x10] sm:$0xff]  ;;  %v687_v5 = vpack.c.bf16 %v254_v3, %v253_v2  ;;  %v256_v6 = vld [vmem:[#allocation5 + $0x18] sm:$0xff]  ;;  %vm257_vm1 = vcmask 261120   ;;  %vm407_vm2 = vcmask 57344  }
  0x59   : > { %676 = vmatprep.subr.mxu1 %v931_v1  ;;  %678 = vmatprep.mubr.msk.f32.mxu1 %vm930_vm0, %v931_v1  ;;  %s249_s21 = scalar_select %p248_p4, %s980_s19, 1  ;;  %v251_v7 = vld [vmem:[%s213_s13] sm:$0xff]  ;;  %v690_v8 = vpack.c.bf16 %v256_v6, %v255_v4  ;;  %vm419_vm3 = vcmask 64512  }
  0x5a   : > { %677 = vmatpush3.xpose.msk.msra.mxu1 %vm257_vm1, %v251_v7  ;;  %688 = vmatpush3.bf16.msra.mxu0 %v687_v5  ;;  %s247_s29 = scalar_lea.vmem [#allocation8], %s1095_s25  ;;  %s652_s10 = sshll.u32 %s980_s19, 4 }
  0x5b   : > { %681 = vmatprep.subr.mxu1 %v931_v1  ;;  %689 = vmatprep.subr.bf16.mxu0 %v929_v0  ;;  %s250_s28 = scalar_lea.vmem %s1196_s1, %s249_s21  ;;  %s1125_s6 = scalar_lea.hbm %s1199_s4, %s652_s10 }
  0x5c   : > { %v252_v9 = vld [vmem:[%s250_s28] sm:$0x1]  ;;  %s526_s5 = sshll.u32 %s247_s29, 4  ;;  %s501_s7 = scalar_lea.sflag [#allocation9], %s1095_s25  ;;  %s527_s5 = int_to_ptr.vmem [resolvable:$true] %s526_s5 }
  0x5d   : > { %s821_s26 = scalar_lea.vmem %s527_s5, 16  ;;  %s932_s8 = smov [#allocation8]  }
  0x5e   : > { %691 = vmatpush3.bf16.msra.mxu0 %v690_v8  ;;  %p822_p6 = scmp.ne.s32.totalorder %s527_s5, %s821_s26  ;;  %s825_s11 = sshll.u32 %s932_s8, 4  ;;  %s826_s11 = int_to_ptr.vmem [resolvable:$false] %s825_s11 }
  0x5f   : > { %s827_s12 = scalar_lea.vmem %s826_s11, 32  ;;  %p828_p13 = scmp.lt.s32.totalorder %s527_s5, %s826_s11 }
  0x60   : > { %p823_p8 = pnand %p822_p6, %p1050_p12  ;;  %p829_p3 = scmp.lt.s32.totalorder %s827_s12, %s821_s26 }
  0x61   : > { %674 = vmatmul.mubr.msk.f32.vlgmr.msra.gmra.mrb[0].mxu0 %vm257_vm1, %v252_v9 }
  0x62   : > { %p824_p10 = pneg %p823_p8  ;;  %p830_p7 = por %p829_p3, %p828_p13 }
  0x64   : > { %p831_p9 = pnand %p830_p7, %p824_p10 }
 0x134   : > { %v327_v10 = vpop.f32.mrb[0].mxu0 }
 0x135   : > { %v675_v11 = vpop.f32.mrb[1].mxu0  ;;  %679 = vmatmul.mubr.msk.f32.vlgmr.msra.gmra.mrb[0].mxu1 %vm257_vm1, %v327_v10 }
 0x136   : > { %682 = vmatpush3.msra.mxu1 %v251_v7  ;;  %683 = vmatprep.mubr.msk.f32.mxu1 %vm930_vm0, %v931_v1 }
 0x208   : > { %v403_v12 = vpop.f32.mrb[0].mxu1 }
 0x209   : > { %v680_v13 = vpop.f32.mrb[1].mxu1  ;;  %v408_v14 = vsel %vm407_vm2, %v403_v12, -inf }
 0x20a   : > { %409 = vmax.xlane.f32.xlu0 %v408_v14 }
 0x297   : > { %v410_v15 = vpop.xlane.xlu0 %409 }
 0x298   : > { %v411_v16 = vsub.f32 %v403_v12, %v410_v15 }
 0x29a   : > { %v412_v17 = vmul.f32 1.442695, %v411_v16 }
 0x29c   : > { %759 = vpow2.f32 %v412_v17 }
 0x2a6   : > { %v760_v18 = vpop.eup %759 }
 0x2a7   : > { %v414_v19 = vsel %vm407_vm2, %v760_v18, 0.0 }
 0x2a8   : > { %415 = vadd.xlane.f32.xlu0 %v414_v19 }
 0x335   : > { %v416_v20 = vpop.xlane.xlu0 %415 }
 0x336   : > { %761 = vrcp.f32 %v416_v20 }
 0x340   : > { %v762_v21 = vpop.eup %761 }
 0x341   : > { %v418_v22 = vmul.f32 %v762_v21, %v760_v18 }
 0x343   : > { %684 = vmatmul.mubr.msk.f32.vlgmr.msra.gmra.mrb[2].mxu1 %vm419_vm3, %v418_v22  ;;  %495 = vst.msk [vmem:[%s247_s29] sm:$0x1] %vm407_vm2, %v418_v22 }
 0x344   : > { %834 = shalt.err (!%p831_p9)
}
 0x345   : > { %s835_s13 = scalar_lea.hbm %s1125_s6, 16  ;;  %s839_s9 = scalar_lea.hbm %s1199_s4, 32 }
 0x346   : > { %p836_p2 = scmp.ne.s32.totalorder %s1125_s6, %s835_s13  ;;  %p840_p1 = scmp.lt.u32.totalorder %s1125_s6, %s1199_s4 }
 0x347   : > { %p841_p11 = scmp.lt.u32.totalorder %s839_s9, %s835_s13  ;;  %p843_p6 = scmp.lt.u32.totalorder %s835_s13, %s1125_s6 }
 0x348   : > { %p837_p5 = pnand %p836_p2, %p1050_p12 }
 0x349   : > { %p842_p4 = por %p841_p11, %p840_p1 }
 0x34a   : > { %p838_p0 = pneg %p837_p5 }
 0x34b   : > { %p844_p8 = por %p843_p6, %p842_p4 }
 0x34d   : > { %p845_p10 = pnand %p844_p8, %p838_p0 }
 0x34f   : > { %848 = shalt.err (!%p845_p10)
}
 0x350   : > { %699 = dma.vmem_to_hbm [thread:$0]  (%p1050_p12), %s527_s5, 16, %s1125_s6, %s501_s7   ;;  %vm493_vm4 = vcmask 253952  }
 0x351   : > { %s241_s14 = scalar_lea.vmem [#allocation7], %s1095_s25  ;;  %s1151_s11 = scalar_lea.hbm %s1198_s3, %s652_s10 }
 0x352   : > { %s513_s20 = sshll.u32 %s241_s14, 4  ;;  %s497_s12 = scalar_lea.sflag [#allocation4], %s1095_s25  ;;  %s1153_s20 = int_to_ptr.vmem [resolvable:$true] %s513_s20 }
 0x353   : > { %s849_s13 = scalar_lea.vmem %s1153_s20, 16  ;;  %s933_s19 = smov [#allocation7]  }
 0x354   : > { %p850_p13 = scmp.ne.s32.totalorder %s1153_s20, %s849_s13  ;;  %s853_s6 = sshll.u32 %s933_s19, 4  ;;  %s854_s6 = int_to_ptr.vmem [resolvable:$false] %s853_s6 }
 0x355   : > { %s855_s5 = scalar_lea.vmem %s854_s6, 32  ;;  %p856_p9 = scmp.lt.s32.totalorder %s1153_s20, %s854_s6 }
 0x356   : > { %p851_p3 = pnand %p850_p13, %p1050_p12  ;;  %p857_p2 = scmp.lt.s32.totalorder %s855_s5, %s849_s13 }
 0x358   : > { %p852_p7 = pneg %p851_p3  ;;  %p858_p5 = por %p857_p2, %p856_p9 }
 0x35a   : > { %p859_p0 = pnand %p858_p5, %p852_p7 }
 0x416   : > { %v489_v23 = vpop.f32.mrb[2].mxu1 }
 0x417   : > { %494 = vst.msk [vmem:[%s241_s14] sm:$0x1] %vm493_vm4, %v489_v23  ;;  %v685_v24 = vpop.f32.mrb[3].mxu1 }
 0x418   : > { %862 = shalt.err (!%p859_p0)
}
 0x419   : > { %s863_s25 = scalar_lea.hbm %s1151_s11, 16  ;;  %s867_s21 = scalar_lea.hbm %s1198_s3, 32 }
 0x41a   : > { %p864_p1 = scmp.ne.s32.totalorder %s1151_s11, %s863_s25  ;;  %p868_p6 = scmp.lt.u32.totalorder %s1151_s11, %s1198_s3 }
 0x41b   : > { %p869_p8 = scmp.lt.u32.totalorder %s867_s21, %s863_s25  ;;  %p871_p13 = scmp.lt.u32.totalorder %s863_s25, %s1151_s11 }
 0x41c   : > { %p865_p11 = pnand %p864_p1, %p1050_p12 }
 0x41d   : > { %p870_p10 = por %p869_p8, %p868_p6 }
 0x41e   : > { %p866_p4 = pneg %p865_p11 }
 0x41f   : > { %p872_p3 = por %p871_p13, %p870_p10 }
 0x421   : > { %p873_p7 = pnand %p872_p3, %p866_p4 }
 0x423   : > { %876 = shalt.err (!%p873_p7)
}
 0x424   : > { %698 = dma.vmem_to_hbm [thread:$0]  (%p1050_p12), %s1153_s20, 16, %s1151_s11, %s497_s12  }
 0x425 PF: > { %s538_s28 = sand.u32 1, %s911_s15   ;;  %p1214_p9 = scmp.ne.s32.totalorder %s1204_s22, 0 }
 0x426   : > { %p1215_p2 = scmp.ge.s32.totalorder %s923_s18, 2  ;;  %s539_s29 = scalar_lea.sflag [#allocation4], %s538_s28 }
 0x428   : > { %p711_p5 = pnand %p1215_p2, %p1214_p9 }
 0x42a   : > { %902 = dma.done.wait (!%p711_p5), %s539_s29, 16  }
 0x42b   : > { %904 = vsyncadd (!%p711_p5), %s539_s29, 4294967280  ;;  %s547_s14 = scalar_lea.sflag [#allocation9], %s538_s28 }
 0x42c   : > { %906 = dma.done.wait (!%p711_p5), %s547_s14, 16  }
 0x42d   : > { %908 = vsyncadd (!%p711_p5), %s547_s14, 4294967280  ;;  %p22_p12 = scmp.ge.s32.totalorder %s1015_s27, 4   ;;  %s1216_s15 = smov %s915_s16 }
 0x42e   : > { %s1217_s16 = smov %s919_s17  ;;  %s1218_s17 = smov %s1046_s24 }
 0x42f   : > { %s1219_s18 = smov %s1015_s27  ;;  %24 = sbr.rel (!%p22_p12) target bundleno = 8 (0x8), region = 101 }
 0x436   :  { %551 = vsyncpa [#allocation3], 1 }
 0x437   :  { %553 = vsyncpa [#allocation3 + $0x1], 1 }
 0x438   :  { %554 = vsyncpa [#allocation6], 1 }
 0x439   :  { %555 = vsyncpa [#allocation4], 1 }
 0x43a   :  { %557 = vsyncpa [#allocation4 + $0x1], 1 }
 0x43b   :  { %558 = vsyncpa [#allocation9], 1 }
 0x43c   :  { %560 = vsyncpa [#allocation9 + $0x1], 1 }

</bundles_post_ra>
